<compile_context>
chip_gen: v7x
topology: tpu7x:2x2x1
jax: 0.10.0
libtpu: 0.0.40
codegen_flags: <defaults>
</compile_context>

<pallas_src>
import functools

import jax
import jax.numpy as jnp
from jax.experimental import pallas as pl
from jax.experimental.pallas import tpu as pltpu


def _round_up(n: int, m: int) -> int:
    return ((n + m - 1) // m) * m


def _decoder_kernel(x_ref, w_ref, b_ref, o_ref, *, num_layers: int):
    """Fused decoder on one batch tile.

    x_ref: (TB, D) f32     -- activation tile
    w_ref: (L, D, D) bf16  -- stacked, zero-padded weights (VMEM-resident)
    b_ref: (L, 1, D) f32   -- stacked, zero-padded biases  (VMEM-resident)
    o_ref: (TB, D) f32
    """
    y = x_ref[...]
    for i in range(num_layers):
        w = w_ref[i]          # (D, D) bf16
        b = b_ref[i]          # (1, D) f32
        # bf16 x bf16 on the MXU, f32 accumulation.
        y = jnp.dot(y.astype(w.dtype), w, preferred_element_type=jnp.float32) + b
        if i != num_layers - 1:
            # sigmoid(y) = 1 / (1 + exp(-y)): exp and reciprocal both on EUP.
            y = pl.reciprocal(1.0 + jnp.exp(-y), approx=True)
    o_ref[...] = y.astype(o_ref.dtype)


def prepare_decoder_params(params):
    """One-time (hoisted) padding + stacking of decoder parameters.

    params: list of (W, b) with W: (in_f, out_f), b: (1, out_f)
    Returns (w_stack bf16 (L,D,D), b_stack f32 (L,1,D), in_f, num_labels, D)
    where D = max layer dim rounded up to 128.  Zero padding guarantees the
    padded lanes (sigmoid(0)=0.5) multiply zero weight rows and never leak
    into real outputs.  NOTE: re-run this if the parameters change.
    """
    num_layers = len(params)
    dims = [params[0][0].shape[0]] + [w.shape[1] for w, _ in params]
    d_pad = _round_up(max(dims), 128)

    w_stack = jnp.zeros((num_layers, d_pad, d_pad), jnp.bfloat16)
    b_stack = jnp.zeros((num_layers, 1, d_pad), jnp.float32)
    for i, (w, b) in enumerate(params):
        in_d, out_d = w.shape
        w_stack = w_stack.at[i, :in_d, :out_d].set(w.astype(jnp.bfloat16))
        b_stack = b_stack.at[i, 0, :out_d].set(b.reshape(-1).astype(jnp.float32))
    return w_stack, b_stack, dims[0], dims[-1], d_pad


def decoder_forward(x, prepared, *, tb_max=512):
    """Decoder forward pass via one fused Pallas kernel.

    x:        (batch, in_features) float32
    prepared: output of prepare_decoder_params
    """
    w_stack, b_stack, in_f, num_labels, d_pad = prepared
    num_layers = w_stack.shape[0]
    batch = x.shape[0]

    batch_p = _round_up(max(batch, 1), 8)
    if batch_p > tb_max:
        tb = tb_max
        batch_p = _round_up(batch_p, tb)
    else:
        tb = batch_p
    grid = (batch_p // tb,)

    # Single lax.pad for the activation (no zeros + dynamic-update-slice).
    x_p = jax.lax.pad(
        x.astype(jnp.float32),
        jnp.float32(0),
        [(0, batch_p - batch, 0), (0, d_pad - in_f, 0)],
    )

    kernel = functools.partial(_decoder_kernel, num_layers=num_layers)
    out_p = pl.pallas_call(
        kernel,
        out_shape=jax.ShapeDtypeStruct((batch_p, d_pad), jnp.float32),
        grid=grid,
        in_specs=[
            pl.BlockSpec((tb, d_pad), lambda i: (i, 0)),
            # Constant index_map -> weights/biases stay resident in VMEM
            # across all batch-grid steps.
            pl.BlockSpec((num_layers, d_pad, d_pad), lambda i: (0, 0, 0)),
            pl.BlockSpec((num_layers, 1, d_pad), lambda i: (0, 0, 0)),
        ],
        out_specs=pl.BlockSpec((tb, d_pad), lambda i: (i, 0)),
        compiler_params=pltpu.CompilerParams(
            dimension_semantics=("parallel",)),
    )(x_p, w_stack, b_stack)

    # Slice away batch/lane padding.
    return out_p[:batch, :num_labels]


def init_decoder_params(key, decoder_features, num_labels):
    """Deterministic init mimicking nn.Linear default (U(-1/sqrt(in), 1/sqrt(in)))."""
    params = []
    dims = list(decoder_features) + [num_labels]
    for in_f, out_f in zip(dims[:-1], dims[1:]):
        key, kw, kb = jax.random.split(key, 3)
        bound = 1.0 / jnp.sqrt(jnp.float32(in_f))
        w = jax.random.uniform(kw, (in_f, out_f), jnp.float32, -bound, bound)
        b = jax.random.uniform(kb, (1, out_f), jnp.float32, -bound, bound)
        params.append((w, b))
    return params


def decoder_reference(x, params):
    n = len(params)
    for idx, (w, b) in enumerate(params):
        x = x @ w + b
        if idx != n - 1:
            x = jax.nn.sigmoid(x)
    return x


if __name__ == "__main__":
    key = jax.random.PRNGKey(0)
    decoder_features = (32, 64, 48)   # blocks: 32->64 (sigmoid), 64->48 (sigmoid)
    num_labels = 10                   # last: 48->10
    batch = 4

    key, kx = jax.random.split(key)
    x = jax.random.normal(kx, (batch, decoder_features[0]), jnp.float32)
    params = init_decoder_params(key, decoder_features, num_labels)

    prepared = prepare_decoder_params(params)   # one-time padding/stacking
    out = decoder_forward(x, prepared)
    out = jax.block_until_ready(out)

    ref = decoder_reference(x, params)
    assert out.shape == (batch, num_labels)
    # bf16 MXU operands + approx reciprocal -> relaxed tolerance vs f32 reference.
    assert jnp.allclose(out, ref, atol=2e-2, rtol=2e-2)

    print("KERNEL_OK")
</pallas_src>

<mosaic_0001>
module attributes {stable_mosaic.version = 11 : i64} {
  func.func @_decoder_kernel(%arg0: i32, %arg1: memref<8x128xf32, #tpu.memory_space<vmem>>, %arg2: memref<3x128x128xbf16, #tpu.memory_space<vmem>>, %arg3: memref<3x1x128xf32, #tpu.memory_space<vmem>>, %arg4: memref<8x128xf32, #tpu.memory_space<vmem>>) attributes {dimension_semantics = [#tpu.dimension_semantics<parallel>], iteration_bounds = array<i64: 1>, scalar_prefetch = 0 : i64, scratch_operands = 0 : i64, tpu.core_type = #tpu.core_type<tc>, window_params = [{transform_indices = @transform_0, window_bounds = array<i64: 8, 128>}, {pipeline_mode = #tpu.pipeline_mode<synchronous>, transform_indices = @transform_1, window_bounds = array<i64: 3, 128, 128>}, {pipeline_mode = #tpu.pipeline_mode<synchronous>, transform_indices = @transform_2, window_bounds = array<i64: 3, 1, 128>}, {transform_indices = @transform_3, window_bounds = array<i64: 8, 128>}]} {
    %c0 = arith.constant 0 : index
    %c0_0 = arith.constant 0 : index
    %0 = vector.load %arg1[%c0, %c0_0] : memref<8x128xf32, #tpu.memory_space<vmem>>, vector<8x128xf32>
    %c0_1 = arith.constant 0 : index
    %c0_2 = arith.constant 0 : index
    %c0_3 = arith.constant 0 : index
    %1 = vector.load %arg2[%c0_1, %c0_2, %c0_3] : memref<3x128x128xbf16, #tpu.memory_space<vmem>>, vector<1x128x128xbf16>
    %2 = vector.shape_cast %1 : vector<1x128x128xbf16> to vector<128x128xbf16>
    %c0_4 = arith.constant 0 : index
    %c0_5 = arith.constant 0 : index
    %c0_6 = arith.constant 0 : index
    %3 = vector.load %arg3[%c0_4, %c0_5, %c0_6] : memref<3x1x128xf32, #tpu.memory_space<vmem>>, vector<1x1x128xf32>
    %4 = vector.shape_cast %3 : vector<1x1x128xf32> to vector<1x128xf32>
    %5 = arith.truncf %0 : vector<8x128xf32> to vector<8x128xbf16>
    %cst = arith.constant dense<0.000000e+00> : vector<8x128xf32>
    %6 = tpu.matmul %5, %2, %cst {dimension_numbers = #tpu.dot_dimension_numbers<[1], [0], [0], [1], [0, 0, 1, 1], [], []>} : vector<8x128xbf16>, vector<128x128xbf16>, vector<8x128xf32> -> vector<8x128xf32>
    %7 = vector.broadcast %4 : vector<1x128xf32> to vector<8x128xf32>
    %8 = arith.addf %6, %7 : vector<8x128xf32>
    %cst_7 = arith.constant 0.000000e+00 : f32
    %9 = vector.broadcast %cst_7 : f32 to vector<8x128xf32>
    %10 = arith.subf %9, %8 : vector<8x128xf32>
    %11 = math.exp %10 : vector<8x128xf32>
    %cst_8 = arith.constant 1.000000e+00 : f32
    %12 = vector.broadcast %cst_8 : f32 to vector<8x128xf32>
    %13 = arith.addf %12, %11 : vector<8x128xf32>
    %14 = tpu.reciprocal %13 {approx = true} : vector<8x128xf32> -> vector<8x128xf32>
    %c1 = arith.constant 1 : index
    %c0_9 = arith.constant 0 : index
    %c0_10 = arith.constant 0 : index
    %15 = vector.load %arg2[%c1, %c0_9, %c0_10] : memref<3x128x128xbf16, #tpu.memory_space<vmem>>, vector<1x128x128xbf16>
    %16 = vector.shape_cast %15 : vector<1x128x128xbf16> to vector<128x128xbf16>
    %c1_11 = arith.constant 1 : index
    %c0_12 = arith.constant 0 : index
    %c0_13 = arith.constant 0 : index
    %17 = vector.load %arg3[%c1_11, %c0_12, %c0_13] : memref<3x1x128xf32, #tpu.memory_space<vmem>>, vector<1x1x128xf32>
    %18 = vector.shape_cast %17 : vector<1x1x128xf32> to vector<1x128xf32>
    %19 = arith.truncf %14 : vector<8x128xf32> to vector<8x128xbf16>
    %cst_14 = arith.constant dense<0.000000e+00> : vector<8x128xf32>
    %20 = tpu.matmul %19, %16, %cst_14 {dimension_numbers = #tpu.dot_dimension_numbers<[1], [0], [0], [1], [0, 0, 1, 1], [], []>} : vector<8x128xbf16>, vector<128x128xbf16>, vector<8x128xf32> -> vector<8x128xf32>
    %21 = vector.broadcast %18 : vector<1x128xf32> to vector<8x128xf32>
    %22 = arith.addf %20, %21 : vector<8x128xf32>
    %cst_15 = arith.constant 0.000000e+00 : f32
    %23 = vector.broadcast %cst_15 : f32 to vector<8x128xf32>
    %24 = arith.subf %23, %22 : vector<8x128xf32>
    %25 = math.exp %24 : vector<8x128xf32>
    %cst_16 = arith.constant 1.000000e+00 : f32
    %26 = vector.broadcast %cst_16 : f32 to vector<8x128xf32>
    %27 = arith.addf %26, %25 : vector<8x128xf32>
    %28 = tpu.reciprocal %27 {approx = true} : vector<8x128xf32> -> vector<8x128xf32>
    %c2 = arith.constant 2 : index
    %c0_17 = arith.constant 0 : index
    %c0_18 = arith.constant 0 : index
    %29 = vector.load %arg2[%c2, %c0_17, %c0_18] : memref<3x128x128xbf16, #tpu.memory_space<vmem>>, vector<1x128x128xbf16>
    %30 = vector.shape_cast %29 : vector<1x128x128xbf16> to vector<128x128xbf16>
    %c2_19 = arith.constant 2 : index
    %c0_20 = arith.constant 0 : index
    %c0_21 = arith.constant 0 : index
    %31 = vector.load %arg3[%c2_19, %c0_20, %c0_21] : memref<3x1x128xf32, #tpu.memory_space<vmem>>, vector<1x1x128xf32>
    %32 = vector.shape_cast %31 : vector<1x1x128xf32> to vector<1x128xf32>
    %33 = arith.truncf %28 : vector<8x128xf32> to vector<8x128xbf16>
    %cst_22 = arith.constant dense<0.000000e+00> : vector<8x128xf32>
    %34 = tpu.matmul %33, %30, %cst_22 {dimension_numbers = #tpu.dot_dimension_numbers<[1], [0], [0], [1], [0, 0, 1, 1], [], []>} : vector<8x128xbf16>, vector<128x128xbf16>, vector<8x128xf32> -> vector<8x128xf32>
    %35 = vector.broadcast %32 : vector<1x128xf32> to vector<8x128xf32>
    %36 = arith.addf %34, %35 : vector<8x128xf32>
    %c0_23 = arith.constant 0 : index
    %c0_24 = arith.constant 0 : index
    %37 = vector.load %arg4[%c0_23, %c0_24] : memref<8x128xf32, #tpu.memory_space<vmem>>, vector<8x128xf32>
    tpu.vector_store %arg4[%c0_23, %c0_24], %36 {strides = array<i32>} : memref<8x128xf32, #tpu.memory_space<vmem>>, vector<8x128xf32>,
    return
  }
  func.func @transform_0(%arg0: i32) -> (i32, i32) {
    %c0_i32 = arith.constant 0 : i32
    %c0_i32_0 = arith.constant 0 : i32
    return %arg0, %c0_i32 : i32, i32
  }
  func.func @transform_1(%arg0: i32) -> (i32, i32, i32) {
    %c0_i32 = arith.constant 0 : i32
    %c0_i32_0 = arith.constant 0 : i32
    %c0_i32_1 = arith.constant 0 : i32
    %c0_i32_2 = arith.constant 0 : i32
    return %c0_i32, %c0_i32_0, %c0_i32_1 : i32, i32, i32
  }
  func.func @transform_2(%arg0: i32) -> (i32, i32, i32) {
    %c0_i32 = arith.constant 0 : i32
    %c0_i32_0 = arith.constant 0 : i32
    %c0_i32_1 = arith.constant 0 : i32
    %c0_i32_2 = arith.constant 0 : i32
    return %c0_i32, %c0_i32_0, %c0_i32_1 : i32, i32, i32
  }
  func.func @transform_3(%arg0: i32) -> (i32, i32) {
    %c0_i32 = arith.constant 0 : i32
    %c0_i32_0 = arith.constant 0 : i32
    return %arg0, %c0_i32 : i32, i32
  }
}

</mosaic_0001>

<bundles_post_ra>
// kernel: tpu_custom_call.1
= control target key start
LH: loop header
LB: loop body
LE: loop exit
PB: predicated region body
PF: predicated region fallthrough
CT: control target
= control target key end

     0   :  { %8 = vsyncpa [#allocation3], 0  ;;  %s746_s0 = inlined_call_operand.hbm [shape: f32[8,128], index: 0, kind: input, shape index: {}]   ;;  %s747_s1 = inlined_call_operand.hbm [shape: bf16[3,128,128], index: 1, kind: input, shape index: {}]   ;;  %s748_s2 = inlined_call_operand.vmem [shape: f32[3,1,128], index: 2, kind: input, shape index: {}]   ;;  %s749_s3 = inlined_call_operand.hbm [shape: f32[8,128], index: 3, kind: output, shape index: {}]  }
   0x1   :  { %9 = vsyncpa [#allocation6], 0 }
   0x2   :  { %10 = vsyncpa [#allocation4], 0  ;;  %s637_s12 = smov [#allocation2]   ;;  %s638_s14 = smov [#allocation5]  }
   0x3   :  { %s17_s13 = sshll.u32 %s637_s12, 4  ;;  %s26_s15 = sshll.u32 %s638_s14, 4  ;;  %s18_s13 = int_to_ptr.vmem [resolvable:$true] %s17_s13  ;;  %s664_s15 = int_to_ptr.vmem [resolvable:$true] %s26_s15 }
   0x4   :  { %s565_s18 = scalar_lea.hbm %s746_s0, 128 }
   0x5   :  { %p566_p0 = scmp.ne.s32.totalorder %s746_s0, %s565_s18  ;;  %p569_p1 = scmp.lt.u32.totalorder %s565_s18, %s746_s0 }
   0x7   :  { %p571_p2 = pnand %p569_p1, %p566_p0 }
   0x9   :  { %574 = shalt.err (!%p571_p2)
}
   0xa   :  { %s575_s23 = scalar_lea.vmem %s18_s13, 128  ;;  %p580_p4 = scmp.lt.s32.totalorder %s18_s13, %s18_s13 }
   0xb   :  { %p576_p3 = scmp.ne.s32.totalorder %s18_s13, %s575_s23  ;;  %p581_p5 = scmp.lt.s32.totalorder %s575_s23, %s575_s23 }
   0xd   :  { %p582_p6 = por %p581_p5, %p580_p4 }
   0xf   :  { %p583_p7 = pnand %p582_p6, %p576_p3 }
  0x11   :  { %586 = shalt.err (!%p583_p7)
}
  0x12   :  { %20 = dma.hbm_to_vmem [thread:$0]  %s746_s0, 128, %s18_s13, [#allocation3]  }
  0x13   :  { %s587_s28 = scalar_lea.hbm %s747_s1, 3072 }
  0x14   :  { %p588_p8 = scmp.ne.s32.totalorder %s747_s1, %s587_s28  ;;  %p591_p9 = scmp.lt.u32.totalorder %s587_s28, %s747_s1 }
  0x16   :  { %p593_p10 = pnand %p591_p9, %p588_p8 }
  0x18   :  { %596 = shalt.err (!%p593_p10)
}
  0x19   :  { %s597_s6 = scalar_lea.vmem %s664_s15, 3072  ;;  %p602_p12 = scmp.lt.s32.totalorder %s664_s15, %s664_s15 }
  0x1a   :  { %p598_p11 = scmp.ne.s32.totalorder %s664_s15, %s597_s6  ;;  %p603_p13 = scmp.lt.s32.totalorder %s597_s6, %s597_s6 }
  0x1c   :  { %p604_p0 = por %p603_p13, %p602_p12 }
  0x1e   :  { %p605_p1 = pnand %p604_p0, %p598_p11 }
  0x20   :  { %608 = shalt.err (!%p605_p1)
}
  0x21   :  { %s639_s0 = smov 64   ;;  %s640_s7 = smov 4  }
  0x22   :  { %32 = dma.hbm_to_vmem [thread:$0]  %s747_s1, 3072, %s664_s15, [#allocation6], %s639_s0, %s639_s0, %s640_s7  }
  0x23   :  { %631 = dma.done.wait [#allocation3], 128  }
  0x24   :  { %632 = vsyncadd [#allocation3], 4294967168 }
  0x25   :  { %633 = dma.done.wait [#allocation6], 3072  }
  0x26   :  { %634 = vsyncadd [#allocation6], 4294964224  ;;  %v641_v0 = vmov 0.0   ;;  %vm642_vm0 = vmmov 0   ;;  %v533_v1 = vld [vmem:[#allocation5] sm:$0xff]   ;;  %v534_v2 = vld [vmem:[#allocation5 + $0x8] sm:$0xff]  }
  0x27   :  { %466 = vmatprep.subr.bf16.mxu0 %v641_v0  ;;  %482 = vmatprep.mubr.msk.bf16.mxu0 %vm642_vm0, %v641_v0  ;;  %v535_v3 = vld [vmem:[#allocation5 + $0x10] sm:$0xff]   ;;  %v536_v4 = vld [vmem:[#allocation5 + $0x18] sm:$0xff]   ;;  %v537_v5 = vld [vmem:[#allocation5 + $0x20] sm:$0xff]   ;;  %s643_s15 = smov [#allocation7]  }
  0x28   :  { %486 = vmatprep.subr.bf16.mxu1 %v641_v0  ;;  %502 = vmatprep.mubr.msk.bf16.mxu1 %vm642_vm0, %v641_v0  ;;  %v538_v6 = vld [vmem:[#allocation5 + $0x28] sm:$0xff]   ;;  %v539_v7 = vld [vmem:[#allocation5 + $0x30] sm:$0xff]   ;;  %v540_v8 = vld [vmem:[#allocation5 + $0x38] sm:$0xff]   ;;  %s400_s16 = sshll.u32 %s643_s15, 4  ;;  %s401_s16 = int_to_ptr.vmem [resolvable:$true] %s400_s16 }
  0x29   :  { %467 = vmatpush3.bf16.msra.mxu0 %v533_v1  ;;  %v42_v9 = vld [vmem:[#allocation2] sm:$0xff]  ;;  %v541_v11 = vld [vmem:[#allocation5 + $0x40] sm:$0xff]   ;;  %v542_v12 = vld [vmem:[#allocation5 + $0x48] sm:$0xff]   ;;  %s609_s17 = scalar_lea.vmem %s401_s16, 128  ;;  %p614_p3 = scmp.lt.s32.totalorder %s401_s16, %s401_s16 }
  0x2a   :  { %468 = vmatprep.subr.bf16.mxu0 %v641_v0  ;;  %v60_v10 = vpack.c.bf16 %v42_v9, %v42_v9  ;;  %487 = vmatpush3.bf16.msra.mxu1 %v541_v11  ;;  %v543_v13 = vld [vmem:[#allocation5 + $0x50] sm:$0xff]   ;;  %v544_v14 = vld [vmem:[#allocation5 + $0x58] sm:$0xff]   ;;  %v545_v15 = vld [vmem:[#allocation5 + $0x60] sm:$0xff]   ;;  %p610_p2 = scmp.ne.s32.totalorder %s401_s16, %s609_s17  ;;  %p615_p4 = scmp.lt.s32.totalorder %s609_s17, %s609_s17 }
  0x2b   :  { %488 = vmatprep.subr.bf16.mxu1 %v641_v0  ;;  %v546_v16 = vld [vmem:[#allocation5 + $0x68] sm:$0xff]   ;;  %v547_v17 = vld [vmem:[#allocation5 + $0x70] sm:$0xff]   ;;  %v548_v18 = vld [vmem:[#allocation5 + $0x78] sm:$0xff]  }
  0x2c   :  { %v410_v19 = vld [vmem:[%s748_s2] ss:$0 sm:$0xff]  ;;  %v549_v31 = vld [vmem:[#allocation5 + $0x80] sm:$0xff]   ;;  %v550_v32 = vld [vmem:[#allocation5 + $0x88] sm:$0xff]   ;;  %p616_p5 = por %p615_p4, %p614_p3 }
  0x2d   :  { %469 = vmatpush3.bf16.msra.mxu0 %v534_v2  ;;  %v551_v33 = vld [vmem:[#allocation5 + $0x90] sm:$0xff]   ;;  %v552_v34 = vld [vmem:[#allocation5 + $0x98] sm:$0xff]   ;;  %v553_v35 = vld [vmem:[#allocation5 + $0xa0] sm:$0xff]  }
  0x2e   :  { %470 = vmatprep.subr.bf16.mxu0 %v641_v0  ;;  %489 = vmatpush3.bf16.msra.mxu1 %v542_v12  ;;  %v554_v36 = vld [vmem:[#allocation5 + $0xa8] sm:$0xff]   ;;  %v555_v37 = vld [vmem:[#allocation5 + $0xb0] sm:$0xff]   ;;  %v556_v38 = vld [vmem:[#allocation5 + $0xb8] sm:$0xff]   ;;  %p617_p6 = pnand %p616_p5, %p610_p2 }
  0x2f   :  { %490 = vmatprep.subr.bf16.mxu1 %v641_v0  ;;  %v420_v39 = vld [vmem:[%s748_s2 + $0x1] ss:$0 sm:$0xff]  ;;  %v430_v51 = vld [vmem:[%s748_s2 + $0x2] ss:$0 sm:$0xff] }
  0x31   :  { %471 = vmatpush3.bf16.msra.mxu0 %v535_v3 }
  0x32   :  { %472 = vmatprep.subr.bf16.mxu0 %v641_v0  ;;  %491 = vmatpush3.bf16.msra.mxu1 %v543_v13 }
  0x33   :  { %492 = vmatprep.subr.bf16.mxu1 %v641_v0 }
  0x35   :  { %473 = vmatpush3.bf16.msra.mxu0 %v536_v4 }
  0x36   :  { %474 = vmatprep.subr.bf16.mxu0 %v641_v0  ;;  %493 = vmatpush3.bf16.msra.mxu1 %v544_v14 }
  0x37   :  { %494 = vmatprep.subr.bf16.mxu1 %v641_v0 }
  0x39   :  { %475 = vmatpush3.bf16.msra.mxu0 %v537_v5 }
  0x3a   :  { %476 = vmatprep.subr.bf16.mxu0 %v641_v0  ;;  %495 = vmatpush3.bf16.msra.mxu1 %v545_v15 }
  0x3b   :  { %496 = vmatprep.subr.bf16.mxu1 %v641_v0 }
  0x3d   :  { %477 = vmatpush3.bf16.msra.mxu0 %v538_v6 }
  0x3e   :  { %478 = vmatprep.subr.bf16.mxu0 %v641_v0  ;;  %497 = vmatpush3.bf16.msra.mxu1 %v546_v16 }
  0x3f   :  { %498 = vmatprep.subr.bf16.mxu1 %v641_v0 }
  0x41   :  { %479 = vmatpush3.bf16.msra.mxu0 %v539_v7 }
  0x42   :  { %480 = vmatprep.subr.bf16.mxu0 %v641_v0  ;;  %499 = vmatpush3.bf16.msra.mxu1 %v547_v17 }
  0x43   :  { %500 = vmatprep.subr.bf16.mxu1 %v641_v0 }
  0x45   :  { %481 = vmatpush3.bf16.msra.mxu0 %v540_v8 }
  0x46   :  { %506 = vmatprep.subr.bf16.mxu0 %v641_v0  ;;  %501 = vmatpush3.bf16.msra.mxu1 %v548_v18 }
  0x48   :  { %483 = vmatmul.mubr.bf16.vlgmr.msra.gmra.mrb[0].mxu0 %v60_v10 }
  0x49   :  { %522 = vmatprep.mubr.msk.bf16.mxu0 %vm642_vm0, %v641_v0  ;;  %507 = vmatpush3.bf16.msra.mxu0 %v549_v31 }
  0x4a   :  { %508 = vmatprep.subr.bf16.mxu0 %v641_v0 }
  0x4d   :  { %509 = vmatpush3.bf16.msra.mxu0 %v550_v32 }
  0x4e   :  { %510 = vmatprep.subr.bf16.mxu0 %v641_v0 }
  0x51   :  { %511 = vmatpush3.bf16.msra.mxu0 %v551_v33 }
  0x52   :  { %512 = vmatprep.subr.bf16.mxu0 %v641_v0 }
  0x55   :  { %513 = vmatpush3.bf16.msra.mxu0 %v552_v34 }
  0x56   :  { %514 = vmatprep.subr.bf16.mxu0 %v641_v0 }
  0x59   :  { %515 = vmatpush3.bf16.msra.mxu0 %v553_v35 }
  0x5a   :  { %516 = vmatprep.subr.bf16.mxu0 %v641_v0 }
  0x5d   :  { %517 = vmatpush3.bf16.msra.mxu0 %v554_v36 }
  0x5e   :  { %518 = vmatprep.subr.bf16.mxu0 %v641_v0 }
  0x61   :  { %519 = vmatpush3.bf16.msra.mxu0 %v555_v37 }
  0x62   :  { %520 = vmatprep.subr.bf16.mxu0 %v641_v0 }
  0x65   :  { %521 = vmatpush3.bf16.msra.mxu0 %v556_v38 }
 0x11b   :  { %v149_v20 = vpop.f32.mrb[0].mxu0 }
 0x11c   :  { %v150_v21 = vadd.f32 %v410_v19, %v149_v20  ;;  %v484_v22 = vpop.f32.mrb[1].mxu0 }
 0x11d   :  { %v152_v23 = vpop.f32.mrb[2].mxu0 }
 0x11e   :  { %v155_v24 = vsub.f32 0.0, %v150_v21  ;;  %v485_v25 = vpop.f32.mrb[3].mxu0 }
 0x120   :  { %v156_v26 = vmul.f32 1.442695, %v155_v24 }
 0x122   :  { %557 = vpow2.f32 %v156_v26 }
 0x12c   :  { %v558_v27 = vpop.eup %557 }
 0x12d   :  { %v158_v28 = vadd.f32 1.0, %v558_v27 }
 0x12f   :  { %559 = vrcp.f32 %v158_v28 }
 0x139   :  { %v560_v29 = vpop.eup %559 }
 0x13a   :  { %v179_v30 = vpack.c.bf16 %v560_v29, %v560_v29 }
 0x13c   :  { %503 = vmatmul.mubr.bf16.vlgmr.msra.gmra.mrb[0].mxu1 %v179_v30 }
 0x20f   :  { %v268_v40 = vpop.f32.mrb[0].mxu1 }
 0x210   :  { %v269_v41 = vadd.f32 %v420_v39, %v268_v40  ;;  %v504_v42 = vpop.f32.mrb[1].mxu1 }
 0x211   :  { %v271_v43 = vpop.f32.mrb[2].mxu1 }
 0x212   :  { %v274_v44 = vsub.f32 0.0, %v269_v41  ;;  %v505_v45 = vpop.f32.mrb[3].mxu1 }
 0x214   :  { %v275_v46 = vmul.f32 1.442695, %v274_v44 }
 0x216   :  { %561 = vpow2.f32 %v275_v46 }
 0x220   :  { %v562_v47 = vpop.eup %561 }
 0x221   :  { %v277_v48 = vadd.f32 1.0, %v562_v47 }
 0x223   :  { %563 = vrcp.f32 %v277_v48 }
 0x22d   :  { %v564_v49 = vpop.eup %563 }
 0x22e   :  { %v298_v50 = vpack.c.bf16 %v564_v49, %v564_v49 }
 0x230   :  { %523 = vmatmul.mubr.bf16.vlgmr.msra.gmra.mrb[4].mxu0 %v298_v50 }
 0x303   :  { %v387_v52 = vpop.f32.mrb[4].mxu0 }
 0x304   :  { %v388_v53 = vadd.f32 %v430_v51, %v387_v52  ;;  %v524_v54 = vpop.f32.mrb[5].mxu0 }
 0x305   :  { %v390_v55 = vpop.f32.mrb[6].mxu0 }
 0x306   :  { %393 = vst [vmem:[#allocation7] sm:$0xff] %v388_v53  ;;  %v525_v56 = vpop.f32.mrb[7].mxu0 }
 0x307   :  { %620 = shalt.err (!%p617_p6)
}
 0x308   :  { %s621_s2 = scalar_lea.hbm %s749_s3, 128 }
 0x309   :  { %p622_p7 = scmp.ne.s32.totalorder %s749_s3, %s621_s2  ;;  %p625_p8 = scmp.lt.u32.totalorder %s621_s2, %s749_s3 }
 0x30b   :  { %p627_p9 = pnand %p625_p8, %p622_p7 }
 0x30d   :  { %630 = shalt.err (!%p627_p9)
}
 0x30e   :  { %403 = dma.vmem_to_hbm [thread:$0]  %s401_s16, 128, %s749_s3, [#allocation4]  }
 0x30f   :  { %635 = dma.done.wait [#allocation4], 128  }
 0x310   :  { %636 = vsyncadd [#allocation4], 4294967168 }
 0x311   :  { %407 = vsyncpa [#allocation3], 1 }
 0x312   :  { %408 = vsyncpa [#allocation6], 1 }
 0x313   :  { %409 = vsyncpa [#allocation4], 1 }

</bundles_post_ra>
